<compile_context>
chip_gen: v5e
topology: v5e:2x2
jax: 0.10.0
libtpu: 0.0.40
codegen_flags: <defaults>
</compile_context>

<pallas_src>
import math
import jax
import jax.numpy as jnp
from jax.experimental import pallas as pl
from jax.experimental.pallas import tpu as pltpu

EMBEDDING_DIM = 32
PROJECTION_DIM = 256
LN_EPS = 1e-5


def projection_head_kernel(x_ref, w1_ref, w2_ref, params_ref, o_ref):
    # params_ref rows: 0 = b1, 1 = b2, 2 = gamma, 3 = beta   (each (1, P), f32)
    b1 = params_ref[0:1, :]
    b2 = params_ref[1:2, :]
    gamma = params_ref[2:3, :]
    beta = params_ref[3:4, :]

    # projected = x @ W1 + b1  (bf16 x bf16 matmul on the MXU, f32 accumulation)
    x_bf = x_ref[...].astype(jnp.bfloat16)
    projected = jnp.dot(x_bf, w1_ref[...], preferred_element_type=jnp.float32)
    projected = projected + b1

    # GELU, tanh approximation: the tanh goes to the EUP slot and co-issues
    # with VALU work.  (Exact erf GELU has no EUP path and lowers to ~20+ f32
    # VALU ops/element, which was the binding slot in this kernel.)
    h = jax.nn.gelu(projected, approximate=True)

    # fc: h @ W2 + b2   (bf16 x bf16, f32 accumulation)
    h = jnp.dot(h.astype(jnp.bfloat16), w2_ref[...],
                preferred_element_type=jnp.float32)
    h = h + b2

    # Dropout: eval-mode identity.
    # TODO(synk): training-mode dropout would need pltpu.prng_seed/prng_random_bits.

    # Residual add + LayerNorm over the projection dim (f32 statistics).
    y = h + projected
    mean = jnp.mean(y, axis=-1, keepdims=True)
    centered = y - mean
    var = jnp.mean(centered * centered, axis=-1, keepdims=True)
    out = centered * jax.lax.rsqrt(var + LN_EPS) * gamma + beta

    # Cast only on the final store (bf16 output halves the dominant HBM stream).
    o_ref[...] = out.astype(o_ref.dtype)


def pack_projection_head_params(w1, b1, w2, b2, gamma, beta):
    """One-time parameter prep — do NOT call this per step.

    Casts weights to bf16 (halves HBM weight traffic; MXU takes bf16) and
    packs b1/b2/gamma/beta into a single (4, P) f32 slab (one small DMA in
    the kernel instead of four).

    NOTE: w1 must already be [E, P] and w2 [P, P], i.e. transposed from
    PyTorch nn.Linear's [out, in] storage layout.
    """
    w1_bf = jnp.asarray(w1, dtype=jnp.bfloat16)
    w2_bf = jnp.asarray(w2, dtype=jnp.bfloat16)
    params = jnp.stack([b1, b2, gamma, beta]).astype(jnp.float32)  # (4, P)
    return w1_bf, w2_bf, params


def _round_up(n, m):
    return ((n + m - 1) // m) * m


def projection_head(x, w1_bf, w2_bf, params, *, block_b=256,
                    out_dtype=jnp.bfloat16):
    """x: [B, E] float32.  w1_bf [E, P] bf16, w2_bf [P, P] bf16, params (4, P) f32
    from pack_projection_head_params().  Output: [B, P] in `out_dtype` (bf16 by
    default; LN math is f32 internally, only the final store is quantized)."""
    B, E = x.shape
    P = w1_bf.shape[1]

    # Batch tiling: a single block when B <= 128; otherwise a multiple of 128
    # chosen so the grid has >= 2 (ideally 4) steps -> both v7x TensorCores
    # engage ("parallel" axis) and input/output DMA double-buffers behind
    # compute.  Weights/params use constant index_maps, so smaller batch tiles
    # add no weight re-fetch.
    if B <= 128:
        tb = B
    else:
        tb = min(block_b, max(128, _round_up(pl.cdiv(B, 4), 128)))
    grid = (pl.cdiv(B, tb),)
    # NOTE: when B % tb != 0 the padded tail block runs LayerNorm on garbage
    # rows; that is safe (rows are independent, out-of-range writeback is
    # dropped) — do not "fix" it with masking.

    out_bytes = B * P * jnp.dtype(out_dtype).itemsize
    cost = pl.CostEstimate(
        flops=2 * B * E * P + 2 * B * P * P,
        transcendentals=B * P,                      # one tanh per element
        bytes_accessed=(x.size * x.dtype.itemsize
                        + w1_bf.size * 2 + w2_bf.size * 2
                        + params.size * 4
                        + out_bytes),
    )

    return pl.pallas_call(
        projection_head_kernel,
        out_shape=jax.ShapeDtypeStruct((B, P), out_dtype),
        grid=grid,
        in_specs=[
            pl.BlockSpec((tb, E), lambda i: (i, 0)),   # x tile (pipelined over batch)
            pl.BlockSpec((E, P), lambda i: (0, 0)),    # w1: VMEM-resident
            pl.BlockSpec((P, P), lambda i: (0, 0)),    # w2: VMEM-resident
            pl.BlockSpec((4, P), lambda i: (0, 0)),    # b1/b2/gamma/beta slab
        ],
        out_specs=pl.BlockSpec((tb, P), lambda i: (i, 0)),
        compiler_params=pltpu.CompilerParams(
            dimension_semantics=("parallel",),         # megacore-shard batch on v7x
            # ~2 MiB live at tb=256 (2x128 KiB bf16 out tile, 2x128 KiB w2,
            # ~0.75-1 MiB f32 intermediates); ~4-5 MiB at tb=512.  8 MiB keeps
            # headroom on the 64 MiB v7x part.
            vmem_limit_bytes=8 << 20,
        ),
        cost_estimate=cost,
    )(x, w1_bf, w2_bf, params)


def reference(x, w1, b1, w2, b2, gamma, beta):
    """Same math with the same bf16 weight/activation casting for the matmuls.
    Uses the exact (erf) GELU to match PyTorch nn.GELU() default; the kernel's
    tanh approximation stays well within the bf16-level tolerance below."""
    xb = x.astype(jnp.bfloat16)
    projected = jnp.dot(xb, w1.astype(jnp.bfloat16),
                        preferred_element_type=jnp.float32) + b1
    h = jax.nn.gelu(projected, approximate=False)
    h = jnp.dot(h.astype(jnp.bfloat16), w2.astype(jnp.bfloat16),
                preferred_element_type=jnp.float32) + b2
    y = h + projected
    mean = y.mean(-1, keepdims=True)
    var = ((y - mean) ** 2).mean(-1, keepdims=True)
    return (y - mean) / jnp.sqrt(var + LN_EPS) * gamma + beta


if __name__ == "__main__":
    key = jax.random.PRNGKey(0)
    kx, k1, kb1, k2, kb2 = jax.random.split(key, 5)

    B = 8
    x = jax.random.normal(kx, (B, EMBEDDING_DIM), dtype=jnp.float32)

    # Deterministic parameter init (Kaiming-uniform-ish scale, like nn.Linear).
    lim1 = 1.0 / math.sqrt(EMBEDDING_DIM)
    w1 = jax.random.uniform(k1, (EMBEDDING_DIM, PROJECTION_DIM),
                            minval=-lim1, maxval=lim1, dtype=jnp.float32)
    b1 = jax.random.uniform(kb1, (PROJECTION_DIM,),
                            minval=-lim1, maxval=lim1, dtype=jnp.float32)
    lim2 = 1.0 / math.sqrt(PROJECTION_DIM)
    w2 = jax.random.uniform(k2, (PROJECTION_DIM, PROJECTION_DIM),
                            minval=-lim2, maxval=lim2, dtype=jnp.float32)
    b2 = jax.random.uniform(kb2, (PROJECTION_DIM,),
                            minval=-lim2, maxval=lim2, dtype=jnp.float32)
    gamma = jnp.ones((PROJECTION_DIM,), dtype=jnp.float32)
    beta = jnp.zeros((PROJECTION_DIM,), dtype=jnp.float32)

    # One-time pack (bf16 weights + fused param slab) — outside the hot path.
    w1_bf, w2_bf, params = pack_projection_head_params(w1, b1, w2, b2, gamma, beta)

    out = projection_head(x, w1_bf, w2_bf, params)
    out = jax.block_until_ready(out)

    ref = reference(x, w1, b1, w2, b2, gamma.reshape(1, -1), beta.reshape(1, -1))
    assert out.shape == (B, PROJECTION_DIM)
    assert out.dtype == jnp.bfloat16
    # bf16 matmul inputs + tanh-GELU + bf16 output quantization -> loose tolerance.
    assert jnp.allclose(out.astype(jnp.float32), ref, atol=3e-2, rtol=3e-2), \
        "mismatch vs reference"

    print("KERNEL_OK")
</pallas_src>

<mosaic_0001>
module attributes {stable_mosaic.version = 11 : i64} {
  func.func @projection_head_kernel(%arg0: i32, %arg1: memref<8x32xf32, #tpu.memory_space<vmem>>, %arg2: memref<32x256xbf16, #tpu.memory_space<vmem>>, %arg3: memref<256x256xbf16, #tpu.memory_space<vmem>>, %arg4: memref<4x256xf32, #tpu.memory_space<vmem>>, %arg5: memref<8x256xbf16, #tpu.memory_space<vmem>>) attributes {dimension_semantics = [#tpu.dimension_semantics<parallel>], iteration_bounds = array<i64: 1>, scalar_prefetch = 0 : i64, scratch_operands = 0 : i64, tpu.core_type = #tpu.core_type<tc>, window_params = [{transform_indices = @transform_0, window_bounds = array<i64: 8, 32>}, {pipeline_mode = #tpu.pipeline_mode<synchronous>, transform_indices = @transform_1, window_bounds = array<i64: 32, 256>}, {pipeline_mode = #tpu.pipeline_mode<synchronous>, transform_indices = @transform_2, window_bounds = array<i64: 256, 256>}, {pipeline_mode = #tpu.pipeline_mode<synchronous>, transform_indices = @transform_3, window_bounds = array<i64: 4, 256>}, {transform_indices = @transform_4, window_bounds = array<i64: 8, 256>}]} {
    %c0 = arith.constant 0 : index
    %c0_0 = arith.constant 0 : index
    %0 = vector.load %arg4[%c0, %c0_0] : memref<4x256xf32, #tpu.memory_space<vmem>>, vector<1x256xf32>
    %c1 = arith.constant 1 : index
    %c0_1 = arith.constant 0 : index
    %1 = vector.load %arg4[%c1, %c0_1] : memref<4x256xf32, #tpu.memory_space<vmem>>, vector<1x256xf32>
    %c2 = arith.constant 2 : index
    %c0_2 = arith.constant 0 : index
    %2 = vector.load %arg4[%c2, %c0_2] : memref<4x256xf32, #tpu.memory_space<vmem>>, vector<1x256xf32>
    %c3 = arith.constant 3 : index
    %c0_3 = arith.constant 0 : index
    %3 = vector.load %arg4[%c3, %c0_3] : memref<4x256xf32, #tpu.memory_space<vmem>>, vector<1x256xf32>
    %c0_4 = arith.constant 0 : index
    %c0_5 = arith.constant 0 : index
    %4 = vector.load %arg1[%c0_4, %c0_5] : memref<8x32xf32, #tpu.memory_space<vmem>>, vector<8x32xf32>
    %5 = arith.truncf %4 : vector<8x32xf32> to vector<8x32xbf16>
    %c0_6 = arith.constant 0 : index
    %c0_7 = arith.constant 0 : index
    %6 = vector.load %arg2[%c0_6, %c0_7] : memref<32x256xbf16, #tpu.memory_space<vmem>>, vector<32x256xbf16>
    %cst = arith.constant dense<0.000000e+00> : vector<8x256xf32>
    %7 = tpu.matmul %5, %6, %cst {dimension_numbers = #tpu.dot_dimension_numbers<[1], [0], [0], [1], [0, 0, 1, 1], [], []>} : vector<8x32xbf16>, vector<32x256xbf16>, vector<8x256xf32> -> vector<8x256xf32>
    %8 = vector.broadcast %0 : vector<1x256xf32> to vector<8x256xf32>
    %9 = arith.addf %7, %8 : vector<8x256xf32>
    %10 = arith.mulf %9, %9 : vector<8x256xf32>
    %11 = arith.mulf %9, %10 : vector<8x256xf32>
    %cst_8 = arith.constant 4.471500e-02 : f32
    %12 = vector.broadcast %cst_8 : f32 to vector<8x256xf32>
    %13 = arith.mulf %12, %11 : vector<8x256xf32>
    %14 = arith.addf %9, %13 : vector<8x256xf32>
    %cst_9 = arith.constant 0.797884583 : f32
    %15 = vector.broadcast %cst_9 : f32 to vector<8x256xf32>
    %16 = arith.mulf %15, %14 : vector<8x256xf32>
    %17 = math.tanh %16 : vector<8x256xf32>
    %cst_10 = arith.constant 1.000000e+00 : f32
    %18 = vector.broadcast %cst_10 : f32 to vector<8x256xf32>
    %19 = arith.addf %18, %17 : vector<8x256xf32>
    %cst_11 = arith.constant 5.000000e-01 : f32
    %20 = vector.broadcast %cst_11 : f32 to vector<8x256xf32>
    %21 = arith.mulf %20, %19 : vector<8x256xf32>
    %22 = arith.mulf %9, %21 : vector<8x256xf32>
    %23 = arith.truncf %22 : vector<8x256xf32> to vector<8x256xbf16>
    %c0_12 = arith.constant 0 : index
    %c0_13 = arith.constant 0 : index
    %24 = vector.load %arg3[%c0_12, %c0_13] : memref<256x256xbf16, #tpu.memory_space<vmem>>, vector<256x256xbf16>
    %cst_14 = arith.constant dense<0.000000e+00> : vector<8x256xf32>
    %25 = tpu.matmul %23, %24, %cst_14 {dimension_numbers = #tpu.dot_dimension_numbers<[1], [0], [0], [1], [0, 0, 1, 1], [], []>} : vector<8x256xbf16>, vector<256x256xbf16>, vector<8x256xf32> -> vector<8x256xf32>
    %26 = vector.broadcast %1 : vector<1x256xf32> to vector<8x256xf32>
    %27 = arith.addf %25, %26 : vector<8x256xf32>
    %28 = arith.addf %27, %9 : vector<8x256xf32>
    %cst_15 = arith.constant dense<0.000000e+00> : vector<8xf32>
    %29 = vector.multi_reduction <add>, %28, %cst_15 [1] : vector<8x256xf32> to vector<8xf32>
    %30 = vector.shape_cast %29 : vector<8xf32> to vector<8x1xf32>
    %cst_16 = arith.constant 2.560000e+02 : f32
    %31 = vector.broadcast %cst_16 : f32 to vector<8x1xf32>
    %32 = arith.divf %30, %31 : vector<8x1xf32>
    %33 = vector.broadcast %32 : vector<8x1xf32> to vector<8x256xf32>
    %34 = arith.subf %28, %33 : vector<8x256xf32>
    %35 = arith.mulf %34, %34 : vector<8x256xf32>
    %cst_17 = arith.constant dense<0.000000e+00> : vector<8xf32>
    %36 = vector.multi_reduction <add>, %35, %cst_17 [1] : vector<8x256xf32> to vector<8xf32>
    %37 = vector.shape_cast %36 : vector<8xf32> to vector<8x1xf32>
    %cst_18 = arith.constant 2.560000e+02 : f32
    %38 = vector.broadcast %cst_18 : f32 to vector<8x1xf32>
    %39 = arith.divf %37, %38 : vector<8x1xf32>
    %cst_19 = arith.constant 9.99999974E-6 : f32
    %40 = vector.broadcast %cst_19 : f32 to vector<8x1xf32>
    %41 = arith.addf %39, %40 : vector<8x1xf32>
    %42 = math.rsqrt %41 : vector<8x1xf32>
    %43 = vector.broadcast %42 : vector<8x1xf32> to vector<8x256xf32>
    %44 = arith.mulf %34, %43 : vector<8x256xf32>
    %45 = vector.broadcast %2 : vector<1x256xf32> to vector<8x256xf32>
    %46 = arith.mulf %44, %45 : vector<8x256xf32>
    %47 = vector.broadcast %3 : vector<1x256xf32> to vector<8x256xf32>
    %48 = arith.addf %46, %47 : vector<8x256xf32>
    %49 = arith.truncf %48 : vector<8x256xf32> to vector<8x256xbf16>
    %c0_20 = arith.constant 0 : index
    %c0_21 = arith.constant 0 : index
    %50 = vector.load %arg5[%c0_20, %c0_21] : memref<8x256xbf16, #tpu.memory_space<vmem>>, vector<8x256xbf16>
    tpu.vector_store %arg5[%c0_20, %c0_21], %49 {strides = array<i32>} : memref<8x256xbf16, #tpu.memory_space<vmem>>, vector<8x256xbf16>,
    return
  }
  func.func @transform_0(%arg0: i32) -> (i32, i32) {
    %c0_i32 = arith.constant 0 : i32
    %c0_i32_0 = arith.constant 0 : i32
    return %arg0, %c0_i32 : i32, i32
  }
  func.func @transform_1(%arg0: i32) -> (i32, i32) {
    %c0_i32 = arith.constant 0 : i32
    %c0_i32_0 = arith.constant 0 : i32
    %c0_i32_1 = arith.constant 0 : i32
    return %c0_i32, %c0_i32_0 : i32, i32
  }
  func.func @transform_2(%arg0: i32) -> (i32, i32) {
    %c0_i32 = arith.constant 0 : i32
    %c0_i32_0 = arith.constant 0 : i32
    %c0_i32_1 = arith.constant 0 : i32
    return %c0_i32, %c0_i32_0 : i32, i32
  }
  func.func @transform_3(%arg0: i32) -> (i32, i32) {
    %c0_i32 = arith.constant 0 : i32
    %c0_i32_0 = arith.constant 0 : i32
    %c0_i32_1 = arith.constant 0 : i32
    return %c0_i32, %c0_i32_0 : i32, i32
  }
  func.func @transform_4(%arg0: i32) -> (i32, i32) {
    %c0_i32 = arith.constant 0 : i32
    %c0_i32_0 = arith.constant 0 : i32
    return %arg0, %c0_i32 : i32, i32
  }
}

</mosaic_0001>

<bundles_post_ra>
// kernel: tpu_custom_call.1
= control target key start
LH: loop header
LB: loop body
LE: loop exit
PB: predicated region body
PF: predicated region fallthrough
CT: control target
= control target key end

     0   :  { %9 = vsyncpa [#allocation3], 0  ;;  %s858_s0 = inlined_call_operand.hbm [shape: f32[8,32], index: 0, kind: input, shape index: {}]   ;;  %s859_s1 = inlined_call_operand.hbm [shape: bf16[32,256], index: 1, kind: input, shape index: {}]   ;;  %s860_s2 = inlined_call_operand.hbm [shape: bf16[256,256], index: 2, kind: input, shape index: {}]   ;;  %s861_s3 = inlined_call_operand.hbm [shape: f32[4,256], index: 3, kind: input, shape index: {}]   ;;  %s862_s4 = inlined_call_operand.hbm [shape: bf16[8,256], index: 4, kind: output, shape index: {}]  }
   0x1   :  { %10 = vsyncpa [#allocation6], 0 }
   0x2   :  { %11 = vsyncpa [#allocation9], 0  ;;  %s28_s17 = sshll.u32 %s859_s1, 4  ;;  %s29_s17 = int_to_ptr.hbm [resolvable:$true] %s28_s17 }
   0x3   :  { %12 = vsyncpa [#allocation4], 0  ;;  %s810_s18 = smov [#allocation5]   ;;  %s18_s22 = sshll.u32 %s858_s0, 4  ;;  %s19_s22 = int_to_ptr.hbm [resolvable:$true] %s18_s22 }
   0x4   :  { %s30_s19 = sshll.u32 %s810_s18, 4  ;;  %s811_s23 = smov 128   ;;  %s31_s19 = int_to_ptr.vmem [resolvable:$true] %s30_s19 }
   0x5   :  { %s812_s24 = smov 8   ;;  %s813_s25 = smov [#allocation2]  }
   0x6   :  { %36 = dma.hbm_to_vmem [thread:$0]  %s29_s17, 512, %s31_s19, [#allocation6], %s811_s23, %s811_s23, %s812_s24  }
   0x7   :  { %s20_s26 = sshll.u32 %s813_s25, 4  ;;  %s41_s29 = sshll.u32 %s860_s2, 4  ;;  %s21_s26 = int_to_ptr.vmem [resolvable:$true] %s20_s26  ;;  %s42_s29 = int_to_ptr.hbm [resolvable:$true] %s41_s29 }
   0x8   :  { %23 = dma.hbm_to_vmem [thread:$0]  %s19_s22, 128, %s21_s26, [#allocation3]  }
   0x9   :  { %s55_s5 = sshll.u32 %s861_s3, 4  ;;  %s814_s6 = smov [#allocation7]   ;;  %s56_s5 = int_to_ptr.hbm [resolvable:$true] %s55_s5 }
   0xa   :  { %s43_s7 = sshll.u32 %s814_s6, 4  ;;  %s815_s0 = smov [#allocation8]   ;;  %s44_s7 = int_to_ptr.vmem [resolvable:$true] %s43_s7 }
   0xb   :  { %49 = dma.hbm_to_vmem [thread:$0]  %s42_s29, 4096, %s44_s7, [#allocation6], %s811_s23, %s811_s23, %s812_s24  }
   0xc   :  { %s57_s8 = sshll.u32 %s815_s0, 4  ;;  %s58_s8 = int_to_ptr.vmem [resolvable:$true] %s57_s8 }
   0xd   :  { %60 = dma.hbm_to_vmem [thread:$0]  %s56_s5, 128, %s58_s8, [#allocation9]  }
   0xe   :  { %802 = dma.done.wait [#allocation3], 128  }
   0xf   :  { %803 = vsyncadd [#allocation3], 4294967168 }
  0x10   :  { %804 = dma.done.wait [#allocation6], 4608  }
  0x11   :  { %805 = vsyncadd [#allocation6], 4294962688 }
  0x12   :  { %806 = dma.done.wait [#allocation9], 128  }
  0x13   :  { %807 = vsyncadd [#allocation9], 4294967168  ;;  %v494_v0 = vld [vmem:[#allocation5 + $0x10] sm:$0xf]  ;;  %v633_v1 = vld [vmem:[#allocation5 + $0x14] sm:$0xf0] }
  0x14   :  { %v632_v2 = vld [vmem:[#allocation5 + $0x14] sm:$0xf]  ;;  %v495_v3 = vor.u32 %v633_v1, %v494_v0  ;;  %v496_v4 = vld [vmem:[#allocation5 + $0x18] sm:$0xf0]  ;;  %v486_v5 = vld [vmem:[#allocation5] sm:$0xf] }
  0x15   :  { %v631_v6 = vld [vmem:[#allocation5 + $0x4] sm:$0xf0]  ;;  %v499_v7 = vor.u32 %v632_v2, %v496_v4  ;;  %v630_v8 = vld [vmem:[#allocation5 + $0x4] sm:$0xf]  ;;  %v488_v9 = vld [vmem:[#allocation5 + $0x8] sm:$0xf0] }
  0x16   :  { %v85_v10 = vld [vmem:[#allocation2] sm:$0xff]  ;;  %126 = vmatpush.bf16.msra.mxu0 %v495_v3  ;;  %v487_v11 = vor.u32 %v631_v6, %v486_v5  ;;  %v560_v12 = vld [vmem:[#allocation7 + $0x70] sm:$0xf]  ;;  %v491_v15 = vor.u32 %v630_v8, %v488_v9  ;;  %v648_v18 = vld [vmem:[#allocation7 + $0x74] sm:$0xf]  ;;  %vm116_vm0 = vcmask 261120  }
  0x17   :  { %v649_v13 = vld [vmem:[#allocation7 + $0x74] sm:$0xf0]  ;;  %v624_v14 = vld [vmem:[#allocation7 + $0xf0] sm:$0xf]  ;;  %139 = vmatpush.bf16.msra.mxu1 %v499_v7  ;;  %v562_v19 = vld [vmem:[#allocation7 + $0x78] sm:$0xf0]  ;;  %v86_v24 = vpack.c.bf16 %v85_v10, %v85_v10 }
  0x18   :  { %v561_v16 = vor.u32 %v649_v13, %v560_v12  ;;  %v665_v17 = vld [vmem:[#allocation7 + $0xf4] sm:$0xf0]  ;;  %v565_v21 = vor.u32 %v648_v18, %v562_v19  ;;  %v664_v22 = vld [vmem:[#allocation7 + $0xf4] sm:$0xf]  ;;  %v626_v23 = vld [vmem:[#allocation7 + $0xf8] sm:$0xf0] }
  0x19   :  { %v625_v20 = vor.u32 %v665_v17, %v624_v14  ;;  %v629_v25 = vor.u32 %v664_v22, %v626_v23  ;;  %v552_v26 = vld [vmem:[#allocation7 + $0x60] sm:$0xf]  ;;  %v647_v27 = vld [vmem:[#allocation7 + $0x64] sm:$0xf0]  ;;  %v646_v31 = vld [vmem:[#allocation7 + $0x64] sm:$0xf] }
  0x1a   :  { %363 = vmatpush.bf16.msra.mxu2 %v561_v16  ;;  %127 = vmatpush.bf16.msra.mxu0 %v487_v11  ;;  %v616_v28 = vld [vmem:[#allocation7 + $0xe0] sm:$0xf]  ;;  %v553_v29 = vor.u32 %v647_v27, %v552_v26  ;;  %v663_v30 = vld [vmem:[#allocation7 + $0xe4] sm:$0xf0]  ;;  %v554_v33 = vld [vmem:[#allocation7 + $0x68] sm:$0xf0] }
  0x1b   :  { %376 = vmatpush.bf16.msra.mxu3 %v625_v20  ;;  %140 = vmatpush.bf16.msra.mxu1 %v491_v15  ;;  %v617_v32 = vor.u32 %v663_v30, %v616_v28  ;;  %v662_v34 = vld [vmem:[#allocation7 + $0xe4] sm:$0xf]  ;;  %v618_v35 = vld [vmem:[#allocation7 + $0xe8] sm:$0xf0]  ;;  %v557_v36 = vor.u32 %v646_v31, %v554_v33  ;;  %v544_v38 = vld [vmem:[#allocation7 + $0x50] sm:$0xf] }
  0x1c   :  { %v621_v37 = vor.u32 %v662_v34, %v618_v35  ;;  %v645_v39 = vld [vmem:[#allocation7 + $0x54] sm:$0xf0]  ;;  %v608_v40 = vld [vmem:[#allocation7 + $0xd0] sm:$0xf]  ;;  %v644_v43 = vld [vmem:[#allocation7 + $0x54] sm:$0xf] }
  0x1d   :  { %500 = vmatmul.msk.bf16.vlgmr.msra.gmra.mxu0 %vm116_vm0, %v86_v24  ;;  %v545_v41 = vor.u32 %v645_v39, %v544_v38  ;;  %v661_v42 = vld [vmem:[#allocation7 + $0xd4] sm:$0xf0]  ;;  %v546_v44 = vld [vmem:[#allocation7 + $0x58] sm:$0xf0]  ;;  %v660_v47 = vld [vmem:[#allocation7 + $0xd4] sm:$0xf] }
  0x1e   :  { %389 = vmatpush.bf16.msrb.mxu0 %v565_v21  ;;  %501 = vmatmul.msk.bf16.vlgmr.msra.gmra.mxu1 %vm116_vm0, %v86_v24  ;;  %v609_v45 = vor.u32 %v661_v42, %v608_v40  ;;  %v549_v46 = vor.u32 %v644_v43, %v546_v44  ;;  %v610_v48 = vld [vmem:[#allocation7 + $0xd8] sm:$0xf0]  ;;  %v536_v50 = vld [vmem:[#allocation7 + $0x40] sm:$0xf]  ;;  %v643_v51 = vld [vmem:[#allocation7 + $0x44] sm:$0xf0] }
  0x1f   :  { %402 = vmatpush.bf16.msrb.mxu1 %v629_v25  ;;  %364 = vmatpush.bf16.msra.mxu2 %v553_v29  ;;  %v613_v49 = vor.u32 %v660_v47, %v610_v48  ;;  %v600_v52 = vld [vmem:[#allocation7 + $0xc0] sm:$0xf]  ;;  %v537_v53 = vor.u32 %v643_v51, %v536_v50  ;;  %v659_v54 = vld [vmem:[#allocation7 + $0xc4] sm:$0xf0]  ;;  %v642_v55 = vld [vmem:[#allocation7 + $0x44] sm:$0xf] }
  0x20   :  { %377 = vmatpush.bf16.msra.mxu3 %v617_v32  ;;  %v538_v56 = vld [vmem:[#allocation7 + $0x48] sm:$0xf0]  ;;  %v601_v57 = vor.u32 %v659_v54, %v600_v52  ;;  %v658_v59 = vld [vmem:[#allocation7 + $0xc4] sm:$0xf]  ;;  %v528_v61 = vld [vmem:[#allocation7 + $0x30] sm:$0xf] }
  0x21   :  { %v541_v58 = vor.u32 %v642_v55, %v538_v56  ;;  %v602_v60 = vld [vmem:[#allocation7 + $0xc8] sm:$0xf0]  ;;  %v641_v63 = vld [vmem:[#allocation7 + $0x34] sm:$0xf0]  ;;  %v592_v0 = vld [vmem:[#allocation7 + $0xb0] sm:$0xf] }
  0x22   :  { %390 = vmatpush.bf16.msrb.mxu0 %v557_v36  ;;  %v605_v62 = vor.u32 %v658_v59, %v602_v60  ;;  %v657_v1 = vld [vmem:[#allocation7 + $0xb4] sm:$0xf0]  ;;  %v529_v2 = vor.u32 %v641_v63, %v528_v61  ;;  %v640_v4 = vld [vmem:[#allocation7 + $0x34] sm:$0xf]  ;;  %v530_v5 = vld [vmem:[#allocation7 + $0x38] sm:$0xf0] }
  0x23   :  { %403 = vmatpush.bf16.msrb.mxu1 %v621_v37  ;;  %365 = vmatpush.bf16.msra.mxu2 %v545_v41  ;;  %v593_v3 = vor.u32 %v657_v1, %v592_v0  ;;  %v656_v6 = vld [vmem:[#allocation7 + $0xb4] sm:$0xf]  ;;  %v533_v7 = vor.u32 %v640_v4, %v530_v5  ;;  %v594_v8 = vld [vmem:[#allocation7 + $0xb8] sm:$0xf0]  ;;  %v520_v9 = vld [vmem:[#allocation7 + $0x20] sm:$0xf] }
  0x24   :  { %378 = vmatpush.bf16.msra.mxu3 %v609_v45  ;;  %v639_v10 = vld [vmem:[#allocation7 + $0x24] sm:$0xf0]  ;;  %v597_v11 = vor.u32 %v656_v6, %v594_v8  ;;  %v584_v12 = vld [vmem:[#allocation7 + $0xa0] sm:$0xf]  ;;  %v638_v14 = vld [vmem:[#allocation7 + $0x24] sm:$0xf] }
  0x25   :  { %v655_v13 = vld [vmem:[#allocation7 + $0xa4] sm:$0xf0]  ;;  %v521_v15 = vor.u32 %v639_v10, %v520_v9  ;;  %v522_v16 = vld [vmem:[#allocation7 + $0x28] sm:$0xf0]  ;;  %v654_v17 = vld [vmem:[#allocation7 + $0xa4] sm:$0xf] }
  0x26   :  { %391 = vmatpush.bf16.msrb.mxu0 %v549_v46  ;;  %v586_v18 = vld [vmem:[#allocation7 + $0xa8] sm:$0xf0]  ;;  %v585_v19 = vor.u32 %v655_v13, %v584_v12  ;;  %v512_v20 = vld [vmem:[#allocation7 + $0x10] sm:$0xf]  ;;  %v637_v21 = vld [vmem:[#allocation7 + $0x14] sm:$0xf0]  ;;  %v525_v22 = vor.u32 %v638_v14, %v522_v16 }
  0x27   :  { %404 = vmatpush.bf16.msrb.mxu1 %v613_v49  ;;  %366 = vmatpush.bf16.msra.mxu2 %v537_v53  ;;  %v589_v23 = vor.u32 %v654_v17, %v586_v18  ;;  %v576_v24 = vld [vmem:[#allocation7 + $0x90] sm:$0xf]  ;;  %v653_v25 = vld [vmem:[#allocation7 + $0x94] sm:$0xf0]  ;;  %v636_v26 = vld [vmem:[#allocation7 + $0x14] sm:$0xf]  ;;  %v513_v30 = vor.u32 %v637_v21, %v512_v20 }
  0x28   :  { %379 = vmatpush.bf16.msra.mxu3 %v601_v57  ;;  %v514_v27 = vld [vmem:[#allocation7 + $0x18] sm:$0xf0]  ;;  %v652_v28 = vld [vmem:[#allocation7 + $0x94] sm:$0xf]  ;;  %v577_v31 = vor.u32 %v653_v25, %v576_v24  ;;  %v504_v32 = vld [vmem:[#allocation7] sm:$0xf] }
  0x29   :  { %v578_v29 = vld [vmem:[#allocation7 + $0x98] sm:$0xf0]  ;;  %v635_v33 = vld [vmem:[#allocation7 + $0x4] sm:$0xf0]  ;;  %v517_v34 = vor.u32 %v636_v26, %v514_v27  ;;  %v568_v36 = vld [vmem:[#allocation7 + $0x80] sm:$0xf] }
  0x2a   :  { %392 = vmatpush.bf16.msrb.mxu0 %v541_v58  ;;  %v581_v35 = vor.u32 %v652_v28, %v578_v29  ;;  %v651_v37 = vld [vmem:[#allocation7 + $0x84] sm:$0xf0]  ;;  %v634_v38 = vld [vmem:[#allocation7 + $0x4] sm:$0xf]  ;;  %v506_v39 = vld [vmem:[#allocation7 + $0x8] sm:$0xf0]  ;;  %v505_v42 = vor.u32 %v635_v33, %v504_v32 }
  0x2b   :  { %405 = vmatpush.bf16.msrb.mxu1 %v605_v62  ;;  %367 = vmatpush.bf16.msra.mxu2 %v529_v2  ;;  %v650_v40 = vld [vmem:[#allocation7 + $0x84] sm:$0xf]  ;;  %v570_v41 = vld [vmem:[#allocation7 + $0x88] sm:$0xf0]  ;;  %v569_v43 = vor.u32 %v651_v37, %v568_v36  ;;  %v509_v44 = vor.u32 %v634_v38, %v506_v39  ;;  %v816_v29 = vmov 256.0   ;;  %s817_s2 = smov [#allocation10]  }
  0x2c   :  { %380 = vmatpush.bf16.msra.mxu3 %v593_v3  ;;  %v573_v45 = vor.u32 %v650_v40, %v570_v41  ;;  %v78_v46 = vld [vmem:[#allocation8] ss:$4 sm:$0x3]  ;;  %s470_s3 = sshll.u32 %s817_s2, 4  ;;  %s472_s11 = sshll.u32 %s862_s4, 4  ;;  %s471_s3 = int_to_ptr.vmem [resolvable:$true] %s470_s3  ;;  %s473_s11 = int_to_ptr.hbm [resolvable:$true] %s472_s11 }
  0x2d   :  { %v92_v47 = vperm.slane %v78_v46, 0  ;;  %v93_v48 = vperm.slane %v78_v46, 1 }
  0x2e   :  { %393 = vmatpush.bf16.msrb.mxu0 %v533_v7 }
  0x2f   :  { %406 = vmatpush.bf16.msrb.mxu1 %v597_v11  ;;  %368 = vmatpush.bf16.msra.mxu2 %v521_v15  ;;  %v80_v11 = vld [vmem:[#allocation8 + $0x1] ss:$4 sm:$0x3] }
  0x30   :  { %381 = vmatpush.bf16.msra.mxu3 %v585_v19  ;;  %v200_v12 = vperm.slane %v80_v11, 1  ;;  %v199_v16 = vperm.slane %v80_v11, 0 }
  0x32   :  { %394 = vmatpush.bf16.msrb.mxu0 %v525_v22 }
  0x33   :  { %407 = vmatpush.bf16.msrb.mxu1 %v589_v23  ;;  %369 = vmatpush.bf16.msra.mxu2 %v513_v30 }
  0x34   :  { %382 = vmatpush.bf16.msra.mxu3 %v577_v31 }
  0x36   :  { %395 = vmatpush.bf16.msrb.mxu0 %v517_v34 }
  0x37   :  { %408 = vmatpush.bf16.msrb.mxu1 %v581_v35  ;;  %370 = vmatpush.bf16.msra.mxu2 %v505_v42 }
  0x38   :  { %383 = vmatpush.bf16.msra.mxu3 %v569_v43 }
  0x3a   :  { %396 = vmatpush.bf16.msrb.mxu0 %v509_v44 }
  0x3b   :  { %409 = vmatpush.bf16.msrb.mxu1 %v573_v45 }
  0x9a   :  { %v129_v49 = vpop.f32.mrf.mxu0 }
  0x9b   :  { %v130_v50 = vadd.f32 %v129_v49, %v92_v47  ;;  %v142_v51 = vpop.f32.mrf.mxu1 }
  0x9c   :  { %v143_v52 = vadd.f32 %v142_v51, %v93_v48  ;;  %v82_v51 = vld [vmem:[#allocation8 + $0x2] ss:$4 sm:$0x3] }
  0x9d   :  { %v146_v53 = vmul.f32 %v130_v50, %v130_v50 }
  0x9e   :  { %v147_v54 = vmul.f32 %v143_v52, %v143_v52 }
  0x9f   :  { %v148_v55 = vmul.f32 %v146_v53, %v130_v50  ;;  %v84_v53 = vld [vmem:[#allocation8 + $0x3] ss:$4 sm:$0x3] }
  0xa0   :  { %v149_v56 = vmul.f32 %v147_v54, %v143_v52  ;;  %v450_v54 = vperm.slane %v82_v51, 0 }
  0xa1   :  { %v150_v57 = vmul.f32 0.044715, %v148_v55  ;;  %v451_v55 = vperm.slane %v82_v51, 1 }
  0xa2   :  { %v131_v58 = vpop.f32.mrf.mxu0  ;;  %v151_v59 = vmul.f32 0.044715, %v149_v56 }
  0xa3   :  { %v144_v60 = vpop.f32.mrf.mxu1  ;;  %v152_v61 = vadd.f32 %v150_v57, %v130_v50 }
  0xa4   :  { %v153_v62 = vadd.f32 %v151_v59, %v143_v52  ;;  %v457_v59 = vperm.slane %v84_v53, 0  ;;  %v458_v60 = vperm.slane %v84_v53, 1 }
  0xa5   :  { %v154_v63 = vmul.f32 0.7978846, %v152_v61 }
  0xa6   :  { %v155_v0 = vmul.f32 0.7978846, %v153_v62 }
  0xa7   :  { %674 = vtanh.f32 %v154_v63 }
  0xa8   :  { %676 = vtanh.f32 %v155_v0 }
  0xa9   :  { %678 = vrcp.f32 %v816_v29 }
  0xad   :  { %v675_v1 = vpop.eup %674 }
  0xae   :  { %v677_v2 = vpop.eup %676  ;;  %v158_v3 = vadd.f32 1.0, %v675_v1 }
  0xaf   :  { %v159_v4 = vadd.f32 1.0, %v677_v2  ;;  %v679_v30 = vpop.eup %678 }
  0xb0   :  { %v160_v5 = vmul.f32 0.5, %v158_v3  ;;  %v421_v31 = vmul.f32 256.0, %v679_v30  ;;  %vm425_vm1 = vweird.f32 %v679_v30 }
  0xb1   :  { %v161_v6 = vmul.f32 0.5, %v159_v4 }
  0xb2   :  { %v162_v7 = vmul.f32 %v160_v5, %v130_v50  ;;  %v422_v32 = vsub.f32 1.0, %v421_v31 }
  0xb3   :  { %v163_v8 = vmul.f32 %v161_v6, %v143_v52 }
  0xb4   :  { %v164_v9 = vpack.c.bf16 %v162_v7, %v162_v7  ;;  %v423_v33 = vmul.f32 %v679_v30, %v422_v32 }
  0xb5   :  { %v165_v10 = vpack.c.bf16 %v163_v8, %v163_v8 }
  0xb6   :  { %371 = vmatmul.bf16.vlgmr.msra.gmra.mxu2 %v164_v9  ;;  %397 = vmatmul.bf16.vlgmr.msrb.gmra.mxu0 %v164_v9  ;;  %v424_v34 = vadd.f32 %v679_v30, %v423_v33 }
  0xb7   :  { %384 = vmatmul.bf16.vlgmr.msra.gmra.mxu3 %v165_v10  ;;  %410 = vmatmul.bf16.vlgmr.msrb.gmra.mxu1 %v165_v10 }
  0xb8   :  { %v426_v35 = vsel %vm425_vm1, %v679_v30, %v424_v34 }
 0x133   :  { %v398_v13 = vpop.f32.mrf.mxu0 }
 0x134   :  { %v411_v14 = vpop.f32.mrf.mxu1  ;;  %v399_v15 = vadd.f32 %v398_v13, %v200_v12 }
 0x136   :  { %v412_v18 = vadd.f32 %v411_v14, %v399_v15 }
 0x138   :  { %v416_v25 = vadd.f32 %v412_v18, %v143_v52 }
 0x139   :  { %v372_v17 = vpop.f32.mrf.mxu2 }
 0x13a   :  { %v373_v19 = vadd.f32 %v372_v17, %v199_v16  ;;  %v385_v20 = vpop.f32.mrf.mxu3 }
 0x13b   :  { %v400_v21 = vpop.f32.mrf.mxu0 }
 0x13c   :  { %v386_v22 = vadd.f32 %v385_v20, %v373_v19  ;;  %v413_v23 = vpop.f32.mrf.mxu1 }
 0x13e   :  { %v415_v24 = vadd.f32 %v386_v22, %v130_v50 }
 0x140   :  { %v417_v26 = vadd.f32 %v416_v25, %v415_v24 }
 0x141   :  { %v374_v27 = vpop.f32.mrf.mxu2 }
 0x142   :  { %v387_v28 = vpop.f32.mrf.mxu3  ;;  %418 = vadd.xlane.f32.xlu0 %v417_v26 }
 0x1b5   :  { %v419_v36 = vpop.xlane.xlu0 %418 }
 0x1b6   :  { %v427_v37 = vmul.f32 %v426_v35, %v419_v36 }
 0x1b8   :  { %v428_v38 = vsub.f32 %v415_v24, %v427_v37  ;;  %v429_v39 = vsub.f32 %v416_v25, %v427_v37 }
 0x1ba   :  { %v430_v40 = vmul.f32 %v428_v38, %v428_v38  ;;  %v431_v41 = vmul.f32 %v429_v39, %v429_v39 }
 0x1bc   :  { %v432_v42 = vadd.f32 %v431_v41, %v430_v40 }
 0x1be   :  { %433 = vadd.xlane.f32.xlu0 %v432_v42 }
 0x231   :  { %v434_v43 = vpop.xlane.xlu0 %433 }
 0x232   :  { %v435_v44 = vmul.f32 %v434_v43, %v426_v35 }
 0x234   :  { %v436_v45 = vadd.f32 1e-05, %v435_v44 }
 0x236   :  { %680 = vrsqrt.f32 %v436_v45  ;;  %vm443_vm3 = vweird.f32 %v436_v45 }
 0x23c   :  { %v681_v46 = vpop.eup %680 }
 0x23d   :  { %v438_v47 = vmul.f32 %v681_v46, %v436_v45  ;;  %vm444_vm2 = vweird.f32 %v681_v46 }
 0x23e   :  { %vm445_vm4 = vmor %vm443_vm3, %vm444_vm2 }
 0x23f   :  { %v439_v48 = vmul.f32 %v681_v46, %v438_v47 }
 0x241   :  { %v440_v49 = vmul.f32 0.5, %v439_v48 }
 0x243   :  { %v441_v50 = vsub.f32 1.5, %v440_v49 }
 0x245   :  { %v442_v52 = vmul.f32 %v681_v46, %v441_v50 }
 0x247   :  { %v446_v56 = vsel %vm445_vm4, %v681_v46, %v442_v52 }
 0x248   :  { %v447_v57 = vmul.f32 %v446_v56, %v428_v38  ;;  %v448_v58 = vmul.f32 %v446_v56, %v429_v39 }
 0x24a   :  { %v454_v61 = vmul.f32 %v450_v54, %v447_v57  ;;  %v455_v62 = vmul.f32 %v451_v55, %v448_v58 }
 0x24c   :  { %v461_v63 = vadd.f32 %v457_v59, %v454_v61  ;;  %v462_v0 = vadd.f32 %v458_v60, %v455_v62 }
 0x24e   :  { %v463_v1 = vpack.c.bf16 %v462_v0, %v461_v63 }
 0x250   :  { %464 = vst [vmem:[#allocation10] sm:$0xff] %v463_v1 }
 0x251   :  { %475 = dma.vmem_to_hbm [thread:$0]  %s471_s3, 128, %s473_s11, [#allocation4]  }
 0x252   :  { %808 = dma.done.wait [#allocation4], 128  }
 0x253   :  { %809 = vsyncadd [#allocation4], 4294967168 }
 0x254   :  { %480 = vsyncpa [#allocation3], 1 }
 0x255   :  { %481 = vsyncpa [#allocation6], 1 }
 0x256   :  { %482 = vsyncpa [#allocation9], 1 }
 0x257   :  { %483 = vsyncpa [#allocation4], 1 }

</bundles_post_ra>
